<compile_context>
chip_gen: v6e
topology: v6e:2x2x1
jax: 0.10.0
libtpu: 0.0.40
codegen_flags: <defaults>
</compile_context>

<pallas_src>
import jax
import jax.numpy as jnp
from jax.experimental import pallas as pl
from jax.experimental.pallas import tpu as pltpu

BN_EPS = 1e-5
HIGHEST = jax.lax.Precision.HIGHEST
MATMUL_IN_BF16 = False   # set True on v6e/v7x at realistic sizes (bf16 MXU operands, f32 accum)


# ---------------------------------------------------------------------------
# Fused kernel
# ---------------------------------------------------------------------------
def _mm(a, b):
    """MXU matmul with f32 accumulation; optionally bf16 operands (v6e/v7x lever)."""
    if MATMUL_IN_BF16:
        a = a.astype(jnp.bfloat16)
        b = b.astype(jnp.bfloat16)
    return jnp.dot(a, b, preferred_element_type=jnp.float32)


def make_fused_kernel(layer_meta, final_meta):
    """Builds the fused kernel body for a fixed (static) layer structure.

    `layer_meta` / `final_meta` hold STATIC (row_offset, rows, cols) slab entries per tensor.
    Activation layout inside the kernel: x is (S, N*C)  (batch folded into lanes).
    """

    def kernel(x_ref, slab_ref, out_ref):
        def rd(entry):                                   # static slab slice -> VMEM value
            off, r, c = entry
            return slab_ref[off:off + r, :c]

        x = x_ref[...]                                   # (S, N*C0)
        for m in layer_meta:                             # static Python unroll over layers
            tw = rd(m["tw"])                             # (S, S)
            tb = rd(m["tb"])                             # (S, 1)   broadcast over lanes
            bn_ts = rd(m["bn_t_scale"])                  # (S, N*Cin)
            bn_th = rd(m["bn_t_shift"])
            bn_fs = rd(m["bn_f_scale"])
            bn_fh = rd(m["bn_f_shift"])
            w1 = rd(m["w1"])                             # (N*Cin, N*FF)  block-diag kron(I_N, w1)
            b1 = rd(m["b1"])                             # (1, N*FF)  broadcast over sublanes
            w2 = rd(m["w2"])                             # (N*FF, N*Cout)
            b2 = rd(m["b2"])                             # (1, N*Cout)

            # ---- TimeMixing: relu(fc1 over time) + residual, then TimeBatchNorm2d ----
            t = jnp.maximum(_mm(tw, x) + tb, 0.0)
            x = (x + t) * bn_ts + bn_th

            # ---- FeatureMixing (normalize_before=True => norm_after is Identity) ----
            if m["has_proj"]:
                x_proj = _mm(x, rd(m["wp"])) + rd(m["bp"])
            else:
                x_proj = x                               # identity projection skipped
            xn = x * bn_fs + bn_fh
            h = jnp.maximum(_mm(xn, w1) + b1, 0.0)
            h = _mm(h, w2) + b2
            x = x_proj + h

        # ---- temporal projection: feature_to_time -> Linear(S,P) -> time_to_feature ----
        wt = rd(final_meta["wt"])                        # (P, S)
        bt = rd(final_meta["bt"])                        # (P, 1)
        out_ref[...] = _mm(wt, x) + bt                   # (P, N*c_last)

    return kernel


# ---------------------------------------------------------------------------
# Wrapper (plain-JAX weight packing + pallas_call plumbing)
# ---------------------------------------------------------------------------
def _prepare_fused_inputs(x, layer_params, wt, bt):
    """Packs all weights into one (rows, 128) f32 slab; returns static slab offsets."""
    N, S, C0 = x.shape
    LANES = 128
    blocks = []
    row = 0

    def add(arr2d):
        nonlocal row
        arr2d = jnp.asarray(arr2d, jnp.float32)
        r, c = arr2d.shape
        rp = -(-r // 8) * 8                              # pad rows to sublane-tile boundary
        blk = jnp.zeros((rp, LANES), jnp.float32).at[:r, :c].set(arr2d)
        blocks.append(blk)
        entry = (row, r, c)                              # static Python ints
        row += rp
        return entry

    eye_n = jnp.eye(N, dtype=jnp.float32)
    layer_meta = []
    for p in layer_params:
        cin, ff = p["w1"].shape
        m = {"has_proj": "wp" in p}
        m["tw"] = add(p["tw"])                                   # (S, S)
        m["tb"] = add(p["tb"][:, None])                          # (S, 1)
        m["bn_t_scale"] = add(jnp.tile(p["bn_t_scale"], (1, N))) # (S, N*cin)
        m["bn_t_shift"] = add(jnp.tile(p["bn_t_shift"], (1, N)))
        m["bn_f_scale"] = add(jnp.tile(p["bn_f_scale"], (1, N)))
        m["bn_f_shift"] = add(jnp.tile(p["bn_f_shift"], (1, N)))
        m["w1"] = add(jnp.kron(eye_n, p["w1"]))                  # (N*cin, N*ff) block-diag
        m["b1"] = add(jnp.tile(p["b1"], N)[None, :])             # (1, N*ff)
        m["w2"] = add(jnp.kron(eye_n, p["w2"]))                  # (N*ff, N*cout)
        m["b2"] = add(jnp.tile(p["b2"], N)[None, :])             # (1, N*cout)
        if m["has_proj"]:
            m["wp"] = add(jnp.kron(eye_n, p["wp"]))              # (N*cin, N*cout)
            m["bp"] = add(jnp.tile(p["bp"], N)[None, :])
        layer_meta.append(m)
    final_meta = {"wt": add(wt), "bt": add(bt[:, None])}

    slab = jnp.concatenate(blocks, axis=0)                       # single weight slab
    x2 = x.transpose(1, 0, 2).reshape(S, N * C0)                 # batch into lanes
    return x2, slab, layer_meta, final_meta


def tsmixer_forward(x, layer_params, wt, bt):
    N, S, _ = x.shape
    P = wt.shape[0]
    c_last = layer_params[-1]["w2"].shape[1]

    x2, slab, layer_meta, final_meta = _prepare_fused_inputs(x, layer_params, wt, bt)
    kernel = make_fused_kernel(layer_meta, final_meta)

    # Advisory cost estimate (helps XLA schedule the latency-bound custom call).
    flops = 0
    for p in layer_params:
        cin, ff = p["w1"].shape
        cout = p["w2"].shape[1]
        flops += 2 * S * S * (N * cin)                    # time mixing
        flops += 2 * S * (N * cin) * (N * ff)             # fc1 (block-diag, counts zeros)
        flops += 2 * S * (N * ff) * (N * cout)            # fc2
        if "wp" in p:
            flops += 2 * S * (N * cin) * (N * cout)       # projection
    flops += 2 * P * S * (N * c_last)                     # temporal projection
    bytes_accessed = 4 * (x2.size + slab.size + P * N * c_last)

    out2 = pl.pallas_call(
        kernel,
        out_shape=jax.ShapeDtypeStruct((P, N * c_last), jnp.float32),
        in_specs=[pl.BlockSpec(memory_space=pltpu.MemorySpace.VMEM),
                  pl.BlockSpec(memory_space=pltpu.MemorySpace.VMEM)],
        out_specs=pl.BlockSpec(memory_space=pltpu.MemorySpace.VMEM),
        cost_estimate=pl.CostEstimate(flops=int(flops), transcendentals=0,
                                      bytes_accessed=int(bytes_accessed)),
    )(x2, slab)
    # out2[p, n*c_last + c] = y[n, p, c]
    return out2.reshape(P, N, c_last).transpose(1, 0, 2)


# ---------------------------------------------------------------------------
# Deterministic parameter init + pure-JAX reference
# ---------------------------------------------------------------------------
def _bn_fold(key, S, C):
    k1, k2, k3, k4 = jax.random.split(key, 4)
    gamma = 1.0 + 0.1 * jax.random.normal(k1, (S, C), jnp.float32)
    beta = 0.1 * jax.random.normal(k2, (S, C), jnp.float32)
    mean = 0.1 * jax.random.normal(k3, (S, C), jnp.float32)
    var = 1.0 + 0.1 * jax.random.uniform(k4, (S, C), jnp.float32)
    scale = gamma / jnp.sqrt(var + BN_EPS)
    shift = beta - mean * scale
    return scale, shift


def init_layer_params(key, S, cin, cout, ff):
    ks = jax.random.split(key, 10)
    p = {
        "tw": 0.2 * jax.random.normal(ks[0], (S, S), jnp.float32),
        "tb": 0.1 * jax.random.normal(ks[1], (S,), jnp.float32),
        "w1": 0.2 * jax.random.normal(ks[4], (cin, ff), jnp.float32),
        "b1": 0.1 * jax.random.normal(ks[5], (ff,), jnp.float32),
        "w2": 0.2 * jax.random.normal(ks[6], (ff, cout), jnp.float32),
        "b2": 0.1 * jax.random.normal(ks[7], (cout,), jnp.float32),
    }
    p["bn_t_scale"], p["bn_t_shift"] = _bn_fold(ks[2], S, cin)
    p["bn_f_scale"], p["bn_f_shift"] = _bn_fold(ks[3], S, cin)
    if cin != cout:
        p["wp"] = 0.2 * jax.random.normal(ks[8], (cin, cout), jnp.float32)
        p["bp"] = 0.1 * jax.random.normal(ks[9], (cout,), jnp.float32)
    return p


def reference_forward(x, layer_params, wt, bt):
    """Pure-JAX reference mirroring the PyTorch forward (eval mode)."""
    for p in layer_params:
        # TimeMixing
        t = jnp.einsum("ts,nsc->ntc", p["tw"], x, precision=HIGHEST)
        t = jnp.maximum(t + p["tb"][None, :, None], 0.0)
        x = (x + t) * p["bn_t_scale"][None] + p["bn_t_shift"][None]
        # FeatureMixing
        if "wp" in p:
            x_proj = jnp.einsum("nsc,co->nso", x, p["wp"], precision=HIGHEST) + p["bp"]
        else:
            x_proj = x
        xn = x * p["bn_f_scale"][None] + p["bn_f_shift"][None]
        h = jnp.maximum(jnp.einsum("nsc,cf->nsf", xn, p["w1"], precision=HIGHEST) + p["b1"], 0.0)
        h = jnp.einsum("nsf,fo->nso", h, p["w2"], precision=HIGHEST) + p["b2"]
        x = x_proj + h
    # temporal projection
    return jnp.einsum("ps,nsc->npc", wt, x, precision=HIGHEST) + bt[None, :, None]


# ---------------------------------------------------------------------------
if __name__ == "__main__":
    key = jax.random.PRNGKey(0)

    # configs: seq_len=16, pred_len=8, enc_in=8, dec_in=4, e_layers=3, d_ff=32,
    #          dropout=0.1 (identity at inference), revin=False
    N, S, P = 2, 16, 8
    enc_in, dec_in, ff_dim, e_layers = 8, 4, 32, 3

    channels = [enc_in] * (e_layers - 1) + [dec_in]   # mixer layers: (8->8), (8->4)
    keys = jax.random.split(key, len(channels) + 2)

    layer_params = [
        init_layer_params(keys[i], S, cin, cout, ff_dim)
        for i, (cin, cout) in enumerate(zip(channels[:-1], channels[1:]))
    ]
    wt = 0.2 * jax.random.normal(keys[-2], (P, S), jnp.float32)   # temporal_projection weight
    bt = 0.1 * jax.random.normal(jax.random.fold_in(keys[-2], 1), (P,), jnp.float32)

    x = jax.random.normal(keys[-1], (N, S, enc_in), jnp.float32)

    fwd = jax.jit(tsmixer_forward)
    out = jax.block_until_ready(fwd(x, layer_params, wt, bt))
    assert out.shape == (N, P, dec_in), out.shape

    ref = jax.block_until_ready(reference_forward(x, layer_params, wt, bt))
    max_err = float(jnp.max(jnp.abs(out - ref)))
    assert jnp.allclose(out, ref, rtol=1e-3, atol=1e-4), max_err

    print("KERNEL_OK")
</pallas_src>

<mosaic_0001>
module attributes {stable_mosaic.version = 11 : i64} {
  func.func @kernel(%arg0: memref<16x16xf32, #tpu.memory_space<vmem>>, %arg1: memref<424x128xf32, #tpu.memory_space<vmem>>, %arg2: memref<8x8xf32, #tpu.memory_space<vmem>>) attributes {dimension_semantics = [], scalar_prefetch = 0 : i64, scratch_operands = 0 : i64, tpu.core_type = #tpu.core_type<tc>} {
    %c0 = arith.constant 0 : index
    %c0_0 = arith.constant 0 : index
    %0 = vector.load %arg0[%c0, %c0_0] : memref<16x16xf32, #tpu.memory_space<vmem>>, vector<16x16xf32>
    %c0_1 = arith.constant 0 : index
    %c0_2 = arith.constant 0 : index
    %1 = vector.load %arg1[%c0_1, %c0_2] : memref<424x128xf32, #tpu.memory_space<vmem>>, vector<16x16xf32>
    %c16 = arith.constant 16 : index
    %c0_3 = arith.constant 0 : index
    %2 = vector.load %arg1[%c16, %c0_3] : memref<424x128xf32, #tpu.memory_space<vmem>>, vector<16x1xf32>
    %c32 = arith.constant 32 : index
    %c0_4 = arith.constant 0 : index
    %3 = vector.load %arg1[%c32, %c0_4] : memref<424x128xf32, #tpu.memory_space<vmem>>, vector<16x16xf32>
    %c48 = arith.constant 48 : index
    %c0_5 = arith.constant 0 : index
    %4 = vector.load %arg1[%c48, %c0_5] : memref<424x128xf32, #tpu.memory_space<vmem>>, vector<16x16xf32>
    %c64 = arith.constant 64 : index
    %c0_6 = arith.constant 0 : index
    %5 = vector.load %arg1[%c64, %c0_6] : memref<424x128xf32, #tpu.memory_space<vmem>>, vector<16x16xf32>
    %c80 = arith.constant 80 : index
    %c0_7 = arith.constant 0 : index
    %6 = vector.load %arg1[%c80, %c0_7] : memref<424x128xf32, #tpu.memory_space<vmem>>, vector<16x16xf32>
    %c96 = arith.constant 96 : index
    %c0_8 = arith.constant 0 : index
    %7 = vector.load %arg1[%c96, %c0_8] : memref<424x128xf32, #tpu.memory_space<vmem>>, vector<16x64xf32>
    %c112 = arith.constant 112 : index
    %c0_9 = arith.constant 0 : index
    %8 = vector.load %arg1[%c112, %c0_9] : memref<424x128xf32, #tpu.memory_space<vmem>>, vector<1x64xf32>
    %c120 = arith.constant 120 : index
    %c0_10 = arith.constant 0 : index
    %9 = vector.load %arg1[%c120, %c0_10] : memref<424x128xf32, #tpu.memory_space<vmem>>, vector<64x16xf32>
    %c184 = arith.constant 184 : index
    %c0_11 = arith.constant 0 : index
    %10 = vector.load %arg1[%c184, %c0_11] : memref<424x128xf32, #tpu.memory_space<vmem>>, vector<1x16xf32>
    %cst = arith.constant dense<0.000000e+00> : vector<16x16xf32>
    %11 = tpu.matmul %1, %0, %cst {dimension_numbers = #tpu.dot_dimension_numbers<[1], [0], [0], [1], [0, 0, 1, 1], [], []>} : vector<16x16xf32>, vector<16x16xf32>, vector<16x16xf32> -> vector<16x16xf32>
    %12 = vector.broadcast %2 : vector<16x1xf32> to vector<16x16xf32>
    %13 = arith.addf %11, %12 : vector<16x16xf32>
    %cst_12 = arith.constant 0.000000e+00 : f32
    %14 = vector.broadcast %cst_12 : f32 to vector<16x16xf32>
    %15 = arith.maximumf %13, %14 : vector<16x16xf32>
    %16 = arith.addf %0, %15 : vector<16x16xf32>
    %17 = arith.mulf %16, %3 : vector<16x16xf32>
    %18 = arith.addf %17, %4 : vector<16x16xf32>
    %19 = arith.mulf %18, %5 : vector<16x16xf32>
    %20 = arith.addf %19, %6 : vector<16x16xf32>
    %cst_13 = arith.constant dense<0.000000e+00> : vector<16x64xf32>
    %21 = tpu.matmul %20, %7, %cst_13 {dimension_numbers = #tpu.dot_dimension_numbers<[1], [0], [0], [1], [0, 0, 1, 1], [], []>} : vector<16x16xf32>, vector<16x64xf32>, vector<16x64xf32> -> vector<16x64xf32>
    %22 = vector.broadcast %8 : vector<1x64xf32> to vector<16x64xf32>
    %23 = arith.addf %21, %22 : vector<16x64xf32>
    %cst_14 = arith.constant 0.000000e+00 : f32
    %24 = vector.broadcast %cst_14 : f32 to vector<16x64xf32>
    %25 = arith.maximumf %23, %24 : vector<16x64xf32>
    %cst_15 = arith.constant dense<0.000000e+00> : vector<16x16xf32>
    %26 = tpu.matmul %25, %9, %cst_15 {dimension_numbers = #tpu.dot_dimension_numbers<[1], [0], [0], [1], [0, 0, 1, 1], [], []>} : vector<16x64xf32>, vector<64x16xf32>, vector<16x16xf32> -> vector<16x16xf32>
    %27 = vector.broadcast %10 : vector<1x16xf32> to vector<16x16xf32>
    %28 = arith.addf %26, %27 : vector<16x16xf32>
    %29 = arith.addf %18, %28 : vector<16x16xf32>
    %c192 = arith.constant 192 : index
    %c0_16 = arith.constant 0 : index
    %30 = vector.load %arg1[%c192, %c0_16] : memref<424x128xf32, #tpu.memory_space<vmem>>, vector<16x16xf32>
    %c208 = arith.constant 208 : index
    %c0_17 = arith.constant 0 : index
    %31 = vector.load %arg1[%c208, %c0_17] : memref<424x128xf32, #tpu.memory_space<vmem>>, vector<16x1xf32>
    %c224 = arith.constant 224 : index
    %c0_18 = arith.constant 0 : index
    %32 = vector.load %arg1[%c224, %c0_18] : memref<424x128xf32, #tpu.memory_space<vmem>>, vector<16x16xf32>
    %c240 = arith.constant 240 : index
    %c0_19 = arith.constant 0 : index
    %33 = vector.load %arg1[%c240, %c0_19] : memref<424x128xf32, #tpu.memory_space<vmem>>, vector<16x16xf32>
    %c256 = arith.constant 256 : index
    %c0_20 = arith.constant 0 : index
    %34 = vector.load %arg1[%c256, %c0_20] : memref<424x128xf32, #tpu.memory_space<vmem>>, vector<16x16xf32>
    %c272 = arith.constant 272 : index
    %c0_21 = arith.constant 0 : index
    %35 = vector.load %arg1[%c272, %c0_21] : memref<424x128xf32, #tpu.memory_space<vmem>>, vector<16x16xf32>
    %c288 = arith.constant 288 : index
    %c0_22 = arith.constant 0 : index
    %36 = vector.load %arg1[%c288, %c0_22] : memref<424x128xf32, #tpu.memory_space<vmem>>, vector<16x64xf32>
    %c304 = arith.constant 304 : index
    %c0_23 = arith.constant 0 : index
    %37 = vector.load %arg1[%c304, %c0_23] : memref<424x128xf32, #tpu.memory_space<vmem>>, vector<1x64xf32>
    %c312 = arith.constant 312 : index
    %c0_24 = arith.constant 0 : index
    %38 = vector.load %arg1[%c312, %c0_24] : memref<424x128xf32, #tpu.memory_space<vmem>>, vector<64x8xf32>
    %c376 = arith.constant 376 : index
    %c0_25 = arith.constant 0 : index
    %39 = vector.load %arg1[%c376, %c0_25] : memref<424x128xf32, #tpu.memory_space<vmem>>, vector<1x8xf32>
    %cst_26 = arith.constant dense<0.000000e+00> : vector<16x16xf32>
    %40 = tpu.matmul %30, %29, %cst_26 {dimension_numbers = #tpu.dot_dimension_numbers<[1], [0], [0], [1], [0, 0, 1, 1], [], []>} : vector<16x16xf32>, vector<16x16xf32>, vector<16x16xf32> -> vector<16x16xf32>
    %41 = vector.broadcast %31 : vector<16x1xf32> to vector<16x16xf32>
    %42 = arith.addf %40, %41 : vector<16x16xf32>
    %cst_27 = arith.constant 0.000000e+00 : f32
    %43 = vector.broadcast %cst_27 : f32 to vector<16x16xf32>
    %44 = arith.maximumf %42, %43 : vector<16x16xf32>
    %45 = arith.addf %29, %44 : vector<16x16xf32>
    %46 = arith.mulf %45, %32 : vector<16x16xf32>
    %47 = arith.addf %46, %33 : vector<16x16xf32>
    %c384 = arith.constant 384 : index
    %c0_28 = arith.constant 0 : index
    %48 = vector.load %arg1[%c384, %c0_28] : memref<424x128xf32, #tpu.memory_space<vmem>>, vector<16x8xf32>
    %cst_29 = arith.constant dense<0.000000e+00> : vector<16x8xf32>
    %49 = tpu.matmul %47, %48, %cst_29 {dimension_numbers = #tpu.dot_dimension_numbers<[1], [0], [0], [1], [0, 0, 1, 1], [], []>} : vector<16x16xf32>, vector<16x8xf32>, vector<16x8xf32> -> vector<16x8xf32>
    %c400 = arith.constant 400 : index
    %c0_30 = arith.constant 0 : index
    %50 = vector.load %arg1[%c400, %c0_30] : memref<424x128xf32, #tpu.memory_space<vmem>>, vector<1x8xf32>
    %51 = vector.broadcast %50 : vector<1x8xf32> to vector<16x8xf32>
    %52 = arith.addf %49, %51 : vector<16x8xf32>
    %53 = arith.mulf %47, %34 : vector<16x16xf32>
    %54 = arith.addf %53, %35 : vector<16x16xf32>
    %cst_31 = arith.constant dense<0.000000e+00> : vector<16x64xf32>
    %55 = tpu.matmul %54, %36, %cst_31 {dimension_numbers = #tpu.dot_dimension_numbers<[1], [0], [0], [1], [0, 0, 1, 1], [], []>} : vector<16x16xf32>, vector<16x64xf32>, vector<16x64xf32> -> vector<16x64xf32>
    %56 = vector.broadcast %37 : vector<1x64xf32> to vector<16x64xf32>
    %57 = arith.addf %55, %56 : vector<16x64xf32>
    %cst_32 = arith.constant 0.000000e+00 : f32
    %58 = vector.broadcast %cst_32 : f32 to vector<16x64xf32>
    %59 = arith.maximumf %57, %58 : vector<16x64xf32>
    %cst_33 = arith.constant dense<0.000000e+00> : vector<16x8xf32>
    %60 = tpu.matmul %59, %38, %cst_33 {dimension_numbers = #tpu.dot_dimension_numbers<[1], [0], [0], [1], [0, 0, 1, 1], [], []>} : vector<16x64xf32>, vector<64x8xf32>, vector<16x8xf32> -> vector<16x8xf32>
    %61 = vector.broadcast %39 : vector<1x8xf32> to vector<16x8xf32>
    %62 = arith.addf %60, %61 : vector<16x8xf32>
    %63 = arith.addf %52, %62 : vector<16x8xf32>
    %c408 = arith.constant 408 : index
    %c0_34 = arith.constant 0 : index
    %64 = vector.load %arg1[%c408, %c0_34] : memref<424x128xf32, #tpu.memory_space<vmem>>, vector<8x16xf32>
    %c416 = arith.constant 416 : index
    %c0_35 = arith.constant 0 : index
    %65 = vector.load %arg1[%c416, %c0_35] : memref<424x128xf32, #tpu.memory_space<vmem>>, vector<8x1xf32>
    %cst_36 = arith.constant dense<0.000000e+00> : vector<8x8xf32>
    %66 = tpu.matmul %64, %63, %cst_36 {dimension_numbers = #tpu.dot_dimension_numbers<[1], [0], [0], [1], [0, 0, 1, 1], [], []>} : vector<8x16xf32>, vector<16x8xf32>, vector<8x8xf32> -> vector<8x8xf32>
    %67 = vector.broadcast %65 : vector<8x1xf32> to vector<8x8xf32>
    %68 = arith.addf %66, %67 : vector<8x8xf32>
    %c0_37 = arith.constant 0 : index
    %c0_38 = arith.constant 0 : index
    %69 = vector.load %arg2[%c0_37, %c0_38] : memref<8x8xf32, #tpu.memory_space<vmem>>, vector<8x8xf32>
    tpu.vector_store %arg2[%c0_37, %c0_38], %68 {strides = array<i32>} : memref<8x8xf32, #tpu.memory_space<vmem>>, vector<8x8xf32>,
    return
  }
}

</mosaic_0001>

<bundles_post_ra>
// kernel: tile.88
= control target key start
LH: loop header
LB: loop body
LE: loop exit
PB: predicated region body
PF: predicated region fallthrough
CT: control target
= control target key end

     0   :  { %s22_s0 = inlined_call_operand.vmem [shape: f32[32], index: 0, kind: input, shape index: {}]   ;;  %s23_s1 = inlined_call_operand.vmem [shape: f32[2,32], index: 1, kind: output, shape index: {}]  }
   0x1   :  { %v4_v0 = vld [vmem:[%s22_s0] ss:$0 sm:$0xff] }
   0x2   :  { %5 = vst [vmem:[%s23_s1] sm:$0x3] %v4_v0 }

// kernel: tile.93
= control target key start
LH: loop header
LB: loop body
LE: loop exit
PB: predicated region body
PF: predicated region fallthrough
CT: control target
= control target key end

     0   :  { %s22_s0 = inlined_call_operand.vmem [shape: f32[8], index: 0, kind: input, shape index: {}]   ;;  %s23_s1 = inlined_call_operand.vmem [shape: f32[2,8], index: 1, kind: output, shape index: {}]  }
   0x1   :  { %v4_v0 = vld [vmem:[%s22_s0] ss:$0 sm:$0xff] }
   0x2   :  { %5 = vst [vmem:[%s23_s1] sm:$0x3] %v4_v0 }

// kernel: tile.123
= control target key start
LH: loop header
LB: loop body
LE: loop exit
PB: predicated region body
PF: predicated region fallthrough
CT: control target
= control target key end

     0   :  { %s22_s0 = inlined_call_operand.vmem [shape: f32[4], index: 0, kind: input, shape index: {}]   ;;  %s23_s1 = inlined_call_operand.vmem [shape: f32[2,4], index: 1, kind: output, shape index: {}]  }
   0x1   :  { %v4_v0 = vld [vmem:[%s22_s0] ss:$0 sm:$0xff] }
   0x2   :  { %5 = vst [vmem:[%s23_s1] sm:$0x3] %v4_v0 }

// kernel: tsmixer_forward.1
= control target key start
LH: loop header
LB: loop body
LE: loop exit
PB: predicated region body
PF: predicated region fallthrough
CT: control target
= control target key end

     0   :  { %vm47_vm0 = vcmask 130048   ;;  %v939_v3 = vmov 0   ;;  %vm232_vm1 = vcmask 523264   ;;  %vm941_vm2 = vmmov 0   ;;  %s1140_s0 = inlined_call_operand.vmem [shape: f32[16,16], index: 0, kind: input, shape index: {}]   ;;  %s1141_s1 = inlined_call_operand.vmem [shape: f32[424,128], index: 1, kind: input, shape index: {}]   ;;  %s1142_s2 = inlined_call_operand.vmem [shape: f32[8,8], index: 2, kind: output, shape index: {}]  }
   0x1   :  { %v12_v0 = vld [vmem:[%s1140_s0 + $0x8] sm:$0xff]  ;;  %v11_v1 = vld [vmem:[%s1140_s0] sm:$0xff]  ;;  %937 = vset.pattern.permute.xlu0 %v939_v3  ;;  %938 = vset.pattern.permute.xlu1 %v939_v3  ;;  %v15_v4 = vld [vmem:[%s1141_s1 + $0x10] sm:$0xff]  ;;  %vm785_vm3 = vcmask 64512  }
   0x2   :  { %v13_v2 = vld [vmem:[%s1141_s1] sm:$0xff]  ;;  %854 = vmatprep.subr.mxu0 %v12_v0  ;;  %v14_v5 = vld [vmem:[%s1141_s1 + $0x8] sm:$0xff]  ;;  %39 = vperm.xlu0 %937, %v15_v4   ;;  %v16_v6 = vld [vmem:[%s1141_s1 + $0x18] sm:$0xff] }
   0x3   :  { %858 = vmatprep.mubr.msk.f32.mxu0 %vm47_vm0, %v13_v2  ;;  %855 = vmatpush3.msra.mxu0 %v12_v0  ;;  %v706_v7 = vld [vmem:[%s1141_s1 + $0x1a0] sm:$0xff]  ;;  %v26_v8 = vld [vmem:[%s1141_s1 + $0x68] sm:$0xff]  ;;  %v35_v10 = vld [vmem:[%s1141_s1 + $0xb0] sm:$0xff] }
   0x4   :  { %856 = vmatprep.subr.mxu0 %v11_v1  ;;  %v25_v9 = vld [vmem:[%s1141_s1 + $0x60] sm:$0xff]  ;;  %v18_v18 = vld [vmem:[%s1141_s1 + $0x28] sm:$0xff]  ;;  %v20_v21 = vld [vmem:[%s1141_s1 + $0x38] sm:$0xff] }
   0x5   :  { %857 = vmatpush3.msra.mxu0 %v11_v1  ;;  %v17_v22 = vld [vmem:[%s1141_s1 + $0x20] sm:$0xff]  ;;  %v19_v25 = vld [vmem:[%s1141_s1 + $0x30] sm:$0xff]  ;;  %v22_v26 = vld [vmem:[%s1141_s1 + $0x48] sm:$0xff] }
   0x6   :  { %859 = vmatmul.mubr.msk.f32.vlgmr.msra.gmra.mxu0 %vm47_vm0, %v14_v5  ;;  %44 = vperm.xlu0 %937, %v16_v6   ;;  %v21_v29 = vld [vmem:[%s1141_s1 + $0x40] sm:$0xff]  ;;  %v23_v32 = vld [vmem:[%s1141_s1 + $0x50] sm:$0xff]  ;;  %v24_v33 = vld [vmem:[%s1141_s1 + $0x58] sm:$0xff] }
   0x7   :  { %861 = vmatprep.subr.mxu0 %v26_v8  ;;  %v34_v37 = vld [vmem:[%s1141_s1 + $0xa8] sm:$0xff]  ;;  %v33_v38 = vld [vmem:[%s1141_s1 + $0xa0] sm:$0xff]  ;;  %v32_v39 = vld [vmem:[%s1141_s1 + $0x98] sm:$0xff] }
   0x8   :  { %862 = vmatpush3.msra.mxu0 %v26_v8  ;;  %v31_v40 = vld [vmem:[%s1141_s1 + $0x90] sm:$0xff]  ;;  %v30_v41 = vld [vmem:[%s1141_s1 + $0x88] sm:$0xff]  ;;  %v29_v42 = vld [vmem:[%s1141_s1 + $0x80] sm:$0xff] }
   0x9   :  { %863 = vmatprep.subr.mxu0 %v25_v9  ;;  %v28_v43 = vld [vmem:[%s1141_s1 + $0x78] sm:$0xff]  ;;  %v793_v44 = vld [vmem:[%s1141_s1 + $0x70] ss:$0 sm:$0xff]  ;;  %v316_v51 = vld [vmem:[%s1141_s1 + $0xc0] sm:$0xff] }
   0xa   :  { %709 = vperm.xlu0 %937, %v706_v7   ;;  %864 = vmatpush3.msra.mxu0 %v25_v9  ;;  %v318_v52 = vld [vmem:[%s1141_s1 + $0xd0] sm:$0xff]  ;;  %v319_v53 = vld [vmem:[%s1141_s1 + $0xd8] sm:$0xff]  ;;  %v317_v61 = vld [vmem:[%s1141_s1 + $0xc8] sm:$0xff] }
   0xb   :  { %868 = vmatprep.subr.mxu0 %v35_v10  ;;  %891 = vmatprep.mubr.msk.f32.mxu1 %vm47_vm0, %v316_v51  ;;  %v796_v54 = vld [vmem:[%s1141_s1 + $0xb8] ss:$0 sm:$0xff]  ;;  %v440_v62 = vld [vmem:[%s1141_s1 + $0x188] sm:$0xff]  ;;  %v439_v63 = vld [vmem:[%s1141_s1 + $0x180] sm:$0xff] }
   0xc   :  { %342 = vperm.xlu1 %938, %v318_v52   ;;  %v321_v8 = vld [vmem:[%s1141_s1 + $0xe8] sm:$0xff] }
  0x10   :  { %347 = vperm.xlu1 %938, %v319_v53  }
  0x7d   :  { %v40_v11 = vpop.permute.xlu0 %39 }
  0x81   :  { %v45_v12 = vpop.permute.xlu0 %44 }
  0xc6   :  { %v860_v13 = vpop.f32.mrf.mxu0 }
  0xc7   :  { %v126_v14 = vadd.f32 %v860_v13, %v45_v12  ;;  %v320_v12 = vld [vmem:[%s1141_s1 + $0xe0] sm:$0xff] }
  0xc8   :  { %v120_v15 = vpop.f32.mrf.mxu0 }
  0xc9   :  { %v130_v16 = vmax.f32 %v126_v14, 0.0  ;;  %v121_v17 = vadd.f32 %v120_v15, %v40_v11  ;;  %v323_v11 = vld [vmem:[%s1141_s1 + $0xf8] sm:$0xff]  ;;  %v322_v15 = vld [vmem:[%s1141_s1 + $0xf0] sm:$0xff] }
  0xcb   :  { %v132_v19 = vadd.f32 %v130_v16, %v12_v0  ;;  %v129_v20 = vmax.f32 %v121_v17, 0.0  ;;  %v329_v0 = vld [vmem:[%s1141_s1 + $0x128] sm:$0xff] }
  0xcc   :  { %v325_v16 = vld [vmem:[%s1141_s1 + $0x108] sm:$0xff] }
  0xcd   :  { %v134_v23 = vmul.f32 %v132_v19, %v18_v18  ;;  %v131_v24 = vadd.f32 %v129_v20, %v11_v1  ;;  %v343_v1 = vpop.permute.xlu1 %342  ;;  %v324_v19 = vld [vmem:[%s1141_s1 + $0x100] sm:$0xff] }
  0xcf   :  { %v136_v27 = vadd.f32 %v134_v23, %v20_v21  ;;  %v133_v28 = vmul.f32 %v131_v24, %v17_v22  ;;  %v326_v22 = vld [vmem:[%s1141_s1 + $0x110] sm:$0xff]  ;;  %v327_v23 = vld [vmem:[%s1141_s1 + $0x118] sm:$0xff] }
  0xd1   :  { %v135_v30 = vadd.f32 %v133_v28, %v19_v25  ;;  %v138_v31 = vmul.f32 %v136_v27, %v22_v26  ;;  %v348_v2 = vpop.permute.xlu1 %347  ;;  %v328_v25 = vld [vmem:[%s1141_s1 + $0x120] sm:$0xff] }
  0xd3   :  { %v137_v34 = vmul.f32 %v135_v30, %v21_v29  ;;  %v140_v36 = vadd.f32 %v138_v31, %v24_v33  ;;  %v337_v29 = vld [vmem:[%s1141_s1 + $0x168] sm:$0xff]  ;;  %v335_v31 = vld [vmem:[%s1141_s1 + $0x158] sm:$0xff] }
  0xd4   :  { %v333_v33 = vld [vmem:[%s1141_s1 + $0x148] sm:$0xff] }
  0xd5   :  { %v139_v35 = vadd.f32 %v137_v34, %v23_v32  ;;  %v334_v32 = vld [vmem:[%s1141_s1 + $0x150] sm:$0xff]  ;;  %v332_v34 = vld [vmem:[%s1141_s1 + $0x140] sm:$0xff] }
  0xd7   :  { %865 = vmatprep.mubr.msk.f32.mxu0 %vm47_vm0, %v139_v35  ;;  %v331_v35 = vld [vmem:[%s1141_s1 + $0x138] sm:$0xff] }
  0xd8   :  { %866 = vmatmul.mubr.msk.f32.vlgmr.msra.gmra.mxu0 %vm47_vm0, %v140_v36 }
  0xd9   :  { %869 = vmatpush3.msra.mxu0 %v35_v10 }
  0xda   :  { %870 = vmatprep.subr.mxu0 %v34_v37 }
  0xdb   :  { %871 = vmatpush3.msra.mxu0 %v34_v37 }
  0xdc   :  { %872 = vmatprep.subr.mxu0 %v33_v38 }
  0xdd   :  { %873 = vmatpush3.msra.mxu0 %v33_v38  ;;  %v804_v38 = vld [vmem:[%s1141_s1 + $0x130] ss:$0 sm:$0xff] }
  0xde   :  { %874 = vmatprep.subr.mxu0 %v32_v39 }
  0xdf   :  { %875 = vmatpush3.msra.mxu0 %v32_v39 }
  0xe0   :  { %876 = vmatprep.subr.mxu0 %v31_v40 }
  0xe1   :  { %877 = vmatpush3.msra.mxu0 %v31_v40 }
  0xe2   :  { %878 = vmatprep.subr.mxu0 %v30_v41 }
  0xe3   :  { %879 = vmatpush3.msra.mxu0 %v30_v41 }
  0xe4   :  { %880 = vmatprep.subr.mxu0 %v29_v42 }
  0xe5   :  { %881 = vmatpush3.msra.mxu0 %v29_v42 }
  0xe6   :  { %882 = vmatprep.subr.mxu0 %v28_v43 }
  0xe7   :  { %883 = vmatpush3.msra.mxu0 %v28_v43 }
 0x198   :  { %v867_v45 = vpop.f32.mrf.mxu0 }
 0x199   :  { %v223_v46 = vadd.f32 %v867_v45, %v793_v44  ;;  %v940_v45 = vmov 0.0  }
 0x19a   :  { %v217_v47 = vpop.f32.mrf.mxu0  ;;  %927 = vmatprep.subr.mxu0 %v940_v45 }
 0x19b   :  { %v218_v48 = vadd.f32 %v793_v44, %v217_v47  ;;  %v227_v50 = vmax.f32 %v223_v46, 0.0  ;;  %v801_v46 = vld [vmem:[%s1141_s1 + $0x190] ss:$0 sm:$0xff]  ;;  %v807_v47 = vld [vmem:[%s1141_s1 + $0x178] ss:$0 sm:$0xff] }
 0x19d   :  { %v226_v49 = vmax.f32 %v218_v48, 0.0 }
 0x19f   :  { %884 = vmatprep.mubr.msk.f32.mxu0 %vm232_vm1, %v226_v49 }
 0x1a0   :  { %885 = vmatmul.mubr.msk.f32.vlgmr.msra.gmra.mxu0 %vm232_vm1, %v227_v50 }
 0x1a1   :  { %931 = vmatprep.mubr.msk.f32.mxu0 %vm941_vm2, %v940_v45 }
 0x260   :  { %v886_v55 = vpop.f32.mrf.mxu0 }
 0x261   :  { %v311_v56 = vadd.f32 %v886_v55, %v796_v54 }
 0x262   :  { %v305_v57 = vpop.f32.mrf.mxu0 }
 0x263   :  { %v315_v58 = vadd.f32 %v311_v56, %v136_v27  ;;  %v306_v59 = vadd.f32 %v796_v54, %v305_v57  ;;  %v338_v27 = vld [vmem:[%s1141_s1 + $0x170] sm:$0xff]  ;;  %v705_v56 = vld [vmem:[%s1141_s1 + $0x198] sm:$0xff]  ;;  %v710_v57 = vpop.permute.xlu0 %709 }
 0x265   :  { %v314_v60 = vadd.f32 %v306_v59, %v135_v30  ;;  %887 = vmatprep.subr.mxu1 %v315_v58  ;;  %v336_v30 = vld [vmem:[%s1141_s1 + $0x160] sm:$0xff] }
 0x266   :  { %888 = vmatpush3.msra.mxu1 %v315_v58 }
 0x267   :  { %889 = vmatprep.subr.mxu1 %v314_v60 }
 0x268   :  { %890 = vmatpush3.msra.mxu1 %v314_v60 }
 0x269   :  { %892 = vmatmul.mubr.msk.f32.vlgmr.msra.gmra.mxu1 %vm47_vm0, %v317_v61  ;;  %894 = vmatprep.subr.mxu1 %v440_v62 }
 0x26a   :  { %895 = vmatpush3.msra.mxu1 %v440_v62 }
 0x26b   :  { %896 = vmatprep.subr.mxu1 %v439_v63 }
 0x26c   :  { %897 = vmatpush3.msra.mxu1 %v439_v63 }
 0x26d   :  { %901 = vmatprep.subr.mxu1 %v329_v0 }
 0x329   :  { %v893_v3 = vpop.f32.mrf.mxu1 }
 0x32a   :  { %v428_v4 = vadd.f32 %v893_v3, %v348_v2 }
 0x32b   :  { %v422_v5 = vpop.f32.mrf.mxu1 }
 0x32c   :  { %v432_v6 = vmax.f32 %v428_v4, 0.0  ;;  %v423_v7 = vadd.f32 %v422_v5, %v343_v1 }
 0x32e   :  { %v434_v9 = vadd.f32 %v432_v6, %v315_v58  ;;  %v431_v10 = vmax.f32 %v423_v7, 0.0 }
 0x330   :  { %v436_v13 = vmul.f32 %v434_v9, %v321_v8  ;;  %v433_v14 = vadd.f32 %v431_v10, %v314_v60 }
 0x332   :  { %v438_v17 = vadd.f32 %v436_v13, %v323_v11  ;;  %v435_v18 = vmul.f32 %v433_v14, %v320_v12 }
 0x334   :  { %v437_v20 = vadd.f32 %v435_v18, %v322_v15  ;;  %v528_v21 = vmul.f32 %v438_v17, %v325_v16 }
 0x336   :  { %v527_v24 = vmul.f32 %v437_v20, %v324_v19  ;;  %898 = vmatprep.mubr.msk.f32.mxu1 %vm47_vm0, %v437_v20  ;;  %v530_v28 = vadd.f32 %v528_v21, %v327_v23 }
 0x337   :  { %899 = vmatmul.mubr.msk.f32.vlgmr.msra.gmra.mxu1 %vm47_vm0, %v438_v17 }
 0x338   :  { %902 = vmatpush3.msra.mxu1 %v329_v0  ;;  %v529_v26 = vadd.f32 %v527_v24, %v326_v22 }
 0x339   :  { %903 = vmatprep.subr.mxu1 %v328_v25 }
 0x33a   :  { %904 = vmatpush3.msra.mxu1 %v328_v25  ;;  %905 = vmatprep.mubr.msk.f32.mxu1 %vm47_vm0, %v529_v26 }
 0x33b   :  { %906 = vmatmul.mubr.msk.f32.vlgmr.msra.gmra.mxu1 %vm47_vm0, %v530_v28  ;;  %908 = vmatprep.subr.mxu1 %v338_v27 }
 0x33c   :  { %909 = vmatpush3.msra.mxu1 %v338_v27 }
 0x33d   :  { %910 = vmatprep.subr.mxu1 %v337_v29 }
 0x33e   :  { %911 = vmatpush3.msra.mxu1 %v337_v29 }
 0x33f   :  { %912 = vmatprep.subr.mxu1 %v336_v30 }
 0x340   :  { %913 = vmatpush3.msra.mxu1 %v336_v30 }
 0x341   :  { %914 = vmatprep.subr.mxu1 %v335_v31 }
 0x342   :  { %915 = vmatpush3.msra.mxu1 %v335_v31 }
 0x343   :  { %916 = vmatprep.subr.mxu1 %v334_v32 }
 0x344   :  { %917 = vmatpush3.msra.mxu1 %v334_v32 }
 0x345   :  { %918 = vmatprep.subr.mxu1 %v333_v33 }
 0x346   :  { %919 = vmatpush3.msra.mxu1 %v333_v33 }
 0x347   :  { %920 = vmatprep.subr.mxu1 %v332_v34 }
 0x348   :  { %921 = vmatpush3.msra.mxu1 %v332_v34 }
 0x349   :  { %922 = vmatprep.subr.mxu1 %v331_v35 }
 0x34a   :  { %923 = vmatpush3.msra.mxu1 %v331_v35 }
 0x3f7   :  { %v900_v36 = vpop.f32.mrf.mxu1 }
 0x3f8   :  { %v524_v49 = vadd.f32 %v900_v36, %v801_v46 }
 0x3f9   :  { %v518_v37 = vpop.f32.mrf.mxu1 }
 0x3fa   :  { %v519_v52 = vadd.f32 %v801_v46, %v518_v37 }
 0x3fb   :  { %v907_v39 = vpop.f32.mrf.mxu1 }
 0x3fc   :  { %v613_v40 = vadd.f32 %v907_v39, %v804_v38 }
 0x3fd   :  { %v607_v41 = vpop.f32.mrf.mxu1 }
 0x3fe   :  { %v608_v42 = vadd.f32 %v804_v38, %v607_v41  ;;  %v617_v44 = vmax.f32 %v613_v40, 0.0 }
 0x400   :  { %v616_v43 = vmax.f32 %v608_v42, 0.0 }
 0x402   :  { %924 = vmatprep.mubr.msk.f32.mxu1 %vm232_vm1, %v616_v43 }
 0x403   :  { %925 = vmatmul.mubr.msk.f32.vlgmr.msra.gmra.mxu1 %vm232_vm1, %v617_v44 }
 0x4c3   :  { %v926_v48 = vpop.f32.mrf.mxu1 }
 0x4c4   :  { %v700_v50 = vadd.f32 %v926_v48, %v807_v47 }
 0x4c5   :  { %v694_v51 = vpop.f32.mrf.mxu1 }
 0x4c6   :  { %v704_v53 = vadd.f32 %v700_v50, %v524_v49  ;;  %v695_v54 = vadd.f32 %v807_v47, %v694_v51 }
 0x4c8   :  { %v703_v55 = vadd.f32 %v695_v54, %v519_v52  ;;  %928 = vmatpush3.msra.mxu0 %v704_v53 }
 0x4c9   :  { %929 = vmatprep.subr.mxu0 %v940_v45 }
 0x4ca   :  { %930 = vmatpush3.msra.mxu0 %v703_v55 }
 0x4cb   :  { %932 = vmatmul.mubr.msk.f32.vlgmr.msra.gmra.mxu0 %vm47_vm0, %v705_v56 }
 0x58b   :  { %v781_v58 = vpop.f32.mrf.mxu0 }
 0x58c   :  { %v782_v59 = vadd.f32 %v781_v58, %v710_v57 }
 0x58d   :  { %v933_v60 = vpop.f32.mrf.mxu0 }
 0x58e   :  { %786 = vst.msk [vmem:[%s1142_s2] sm:$0xff] %vm785_vm3, %v782_v59 }

</bundles_post_ra>
